<compile_context>
chip_gen: v6e
topology: v6e:2x2x1
jax: 0.10.0
libtpu: 0.0.40
codegen_flags: <defaults>
</compile_context>

<pallas_src>
import functools

import jax
import jax.numpy as jnp
from jax.experimental import pallas as pl
from jax.experimental.pallas import tpu as pltpu


# --------------------------------------------------------------------------- utilities

def _round_up(v, m):
    return ((v + m - 1) // m) * m


def _pad_to(a, shape):
    pads = [(0, t - s) for s, t in zip(a.shape, shape)]
    return jnp.pad(a, pads) if any(p[1] for p in pads) else a


def _vmem_capacity_bytes():
    try:
        return int(pltpu.get_tpu_info().vmem_capacity_bytes)
    except Exception:
        return 64 * 1024 * 1024          # conservative (v7x-sized) fallback


def _plan(n_pad0, h_pad, out_pad):
    """Generation-aware row-tile / VMEM planning. Returns (tm, n_pad, vmem_limit, fused)."""
    cap = _vmem_capacity_bytes()
    # v5e/v6e (128 MiB physical) -> 64 MiB working budget; v7x (64 MiB) -> ~44 MiB.
    budget = min(64 << 20, max(cap - (20 << 20), cap // 2))

    if n_pad0 <= 512:
        # Tiny graph: whole problem fits in one tile -> single fused pallas_call.
        need = (n_pad0 * n_pad0 * 2 + 4 * n_pad0 * 128 * 4 + (4 << 20))
        return n_pad0, n_pad0, int(min(cap, max(need, 32 << 20))), True

    def step_bytes(tm):
        n_pad = _round_up(n_pad0, tm)
        return (2 * tm * n_pad * 2                    # bf16 A row tile, double-buffered
                + 2 * n_pad * 128 * 2                 # resident XW / HW slab (bf16)
                + 2 * tm * out_pad * 4                # f32 packed out, double-buffered
                + 2 * tm * out_pad * 2                # bf16 HW out (layer 1)
                + 2 * tm * 128 * 4                    # eps tile
                + (h_pad * out_pad + 2 * out_pad + h_pad) * 4
                + (2 << 20))                          # compiler scratch headroom

    best = None
    for cand in (512, 384, 256, 128):                 # multiples of 128 (bf16-safe tiles)
        if cand > n_pad0 or step_bytes(cand) > int(budget * 0.85):
            continue
        key = (_round_up(n_pad0, cand), -cand)        # least padding, then biggest tile
        if best is None or key < best[0]:
            best = (key, cand)
    tm = best[1] if best is not None else 128
    n_pad = _round_up(n_pad0, tm)
    vmem_limit = int(min(cap, max(budget, step_bytes(tm) + (4 << 20))))
    return tm, n_pad, vmem_limit, False


# --------------------------------------------------------------------------- kernels

def _pack_mu_scale_z(mv, eps, z_dim, out_w):
    """mv lanes [0:z)=mu, [z:2z)=pre-softplus; return one [rows, out_w] packed tile."""
    mu = mv[:, 0:z_dim]
    raw = mv[:, z_dim:2 * z_dim]
    # numerically stable softplus: max(x,0) + log(1 + exp(-|x|))
    scale = jnp.maximum(raw, 0.0) + jnp.log(1.0 + jnp.exp(-jnp.abs(raw)))
    z = mu + scale * eps[:, 0:z_dim]                  # Normal(mu, scale).rsample()
    pieces = [mu, scale, z]
    pad = out_w - 3 * z_dim
    if pad > 0:                                       # trace-time constant
        pieces.append(jnp.zeros((mv.shape[0], pad), jnp.float32))
    # assemble in registers -> ONE unmasked 128-lane store
    return jnp.concatenate(pieces, axis=-1)


def gcn_layer1_kernel(a_ref, xw_ref, b1_ref, wmv_ref, hw_ref):
    """HW[row tile] = relu(A_hat[tile, :] @ XW + b1) @ (Wmu|Wvar), stored bf16."""
    # bf16 x bf16 -> f32-acc MXU path; no in-VMEM upcast of the streamed A tile.
    h = jnp.dot(a_ref[...], xw_ref[...], preferred_element_type=jnp.float32)
    h = jnp.maximum(h + b1_ref[...], 0.0)
    # TODO(synk): F.dropout(p=0.1) training-mode masking not reproduced (eval semantics).
    hw = jnp.dot(h.astype(jnp.bfloat16), wmv_ref[...],
                 preferred_element_type=jnp.float32)
    hw_ref[...] = hw.astype(hw_ref.dtype)


def gcn_layer2_kernel(z_dim, a_ref, hw_ref, bmv_ref, eps_ref, out_ref):
    """Packed [tm, out_pad]: lanes [0:z)=mu, [z:2z)=softplus scale, [2z:3z)=z."""
    mv = jnp.dot(a_ref[...], hw_ref[...], preferred_element_type=jnp.float32)
    mv = mv + bmv_ref[...]
    out_ref[...] = _pack_mu_scale_z(mv, eps_ref[...], z_dim, out_ref.shape[1])


def gcn_fused_kernel(z_dim, a_ref, xw_ref, b1_ref, wmv_ref, bmv_ref, eps_ref, out_ref):
    """Whole forward in one call for tiny graphs (full A fits in a single tile)."""
    h = jnp.dot(a_ref[...], xw_ref[...], preferred_element_type=jnp.float32)
    h = jnp.maximum(h + b1_ref[...], 0.0)
    hw = jnp.dot(h.astype(jnp.bfloat16), wmv_ref[...],
                 preferred_element_type=jnp.float32).astype(jnp.bfloat16)
    mv = jnp.dot(a_ref[...], hw, preferred_element_type=jnp.float32) + bmv_ref[...]
    out_ref[...] = _pack_mu_scale_z(mv, eps_ref[...], z_dim, out_ref.shape[1])


# --------------------------------------------------------------------------- wrapper

def model_vae_forward(a_hat, x, params, eps):
    """Returns (z_mean, z_scale, z) with z = z_mean + z_scale * eps (rsample)."""
    n, i_dim = x.shape
    h_dim = params["w1"].shape[1]
    z_dim = params["wmu"].shape[1]

    i_pad = _round_up(i_dim, 128)
    h_pad = _round_up(h_dim, 128)
    out_pad = _round_up(3 * z_dim, 128)
    n_pad0 = _round_up(n, 128)

    tm, n_pad, vmem_limit, fused = _plan(n_pad0, h_pad, out_pad)
    hp = jax.lax.Precision.HIGHEST

    # A_hat streamed as bf16 (halves the dominant HBM stream); MXU accumulates in f32.
    a_bf = _pad_to(a_hat.astype(jnp.float32), (n_pad, n_pad)).astype(jnp.bfloat16)

    # Hoisted once: XW = X @ W1 (tiny matmul), stored bf16 to feed the MXU bf16 path.
    x_p = _pad_to(x.astype(jnp.float32), (n_pad, i_pad))
    w1_p = _pad_to(params["w1"].astype(jnp.float32), (i_pad, h_pad))
    xw_bf = jnp.dot(x_p, w1_p, precision=hp).astype(jnp.bfloat16)
    b1_p = _pad_to(params["b1"].astype(jnp.float32).reshape(1, -1), (1, h_pad))

    # Fused mu|var weights -> single second-layer matmul; lanes [0:z)=mu, [z:2z)=var.
    wmv = jnp.zeros((h_pad, out_pad), jnp.float32)
    wmv = wmv.at[:h_dim, 0:z_dim].set(params["wmu"].astype(jnp.float32))
    wmv = wmv.at[:h_dim, z_dim:2 * z_dim].set(params["wvar"].astype(jnp.float32))
    wmv_bf = wmv.astype(jnp.bfloat16)
    bmv = jnp.zeros((1, out_pad), jnp.float32)
    bmv = bmv.at[:, 0:z_dim].set(params["bmu"].astype(jnp.float32).reshape(1, -1))
    bmv = bmv.at[:, z_dim:2 * z_dim].set(params["bvar"].astype(jnp.float32).reshape(1, -1))

    # eps as a lane-dense 128-wide slab (no masked partial loads)
    eps_p = _pad_to(eps.astype(jnp.float32), (n_pad, 128))

    cparams = pltpu.CompilerParams(
        dimension_semantics=("parallel",),
        vmem_limit_bytes=vmem_limit)

    if fused:
        packed = pl.pallas_call(
            functools.partial(gcn_fused_kernel, z_dim),
            out_shape=jax.ShapeDtypeStruct((n_pad, out_pad), jnp.float32),
            grid_spec=pltpu.PrefetchScalarGridSpec(
                num_scalar_prefetch=0,
                grid=(1,),
                in_specs=[
                    pl.BlockSpec((n_pad, n_pad), lambda i: (0, 0)),    # A_hat (bf16)
                    pl.BlockSpec((n_pad, h_pad), lambda i: (0, 0)),    # XW (bf16)
                    pl.BlockSpec((1, h_pad), lambda i: (0, 0)),        # b1
                    pl.BlockSpec((h_pad, out_pad), lambda i: (0, 0)),  # Wmu|Wvar (bf16)
                    pl.BlockSpec((1, out_pad), lambda i: (0, 0)),      # bmu|bvar
                    pl.BlockSpec((n_pad, 128), lambda i: (0, 0)),      # eps
                ],
                out_specs=pl.BlockSpec((n_pad, out_pad), lambda i: (0, 0)),
            ),
            compiler_params=cparams,
        )(a_bf, xw_bf, b1_p, wmv_bf, bmv, eps_p)
    else:
        grid = (n_pad // tm,)
        # ---- layer 1 (+ fused H @ Wmv): HW = relu(A @ XW + b1) @ Wmv, bf16, row-tiled
        hw = pl.pallas_call(
            gcn_layer1_kernel,
            out_shape=jax.ShapeDtypeStruct((n_pad, out_pad), jnp.bfloat16),
            grid_spec=pltpu.PrefetchScalarGridSpec(
                num_scalar_prefetch=0,
                grid=grid,
                in_specs=[
                    pl.BlockSpec((tm, n_pad), lambda i: (i, 0)),        # A row tile (bf16)
                    pl.BlockSpec((n_pad, h_pad), lambda i: (0, 0)),     # XW resident (bf16)
                    pl.BlockSpec((1, h_pad), lambda i: (0, 0)),         # b1
                    pl.BlockSpec((h_pad, out_pad), lambda i: (0, 0)),   # Wmu|Wvar (bf16)
                ],
                out_specs=pl.BlockSpec((tm, out_pad), lambda i: (i, 0)),
            ),
            compiler_params=cparams,
        )(a_bf, xw_bf, b1_p, wmv_bf)

        # ---- layer 2: pure A-streaming pass -> packed(mu | softplus | z)
        packed = pl.pallas_call(
            functools.partial(gcn_layer2_kernel, z_dim),
            out_shape=jax.ShapeDtypeStruct((n_pad, out_pad), jnp.float32),
            grid_spec=pltpu.PrefetchScalarGridSpec(
                num_scalar_prefetch=0,
                grid=grid,
                in_specs=[
                    pl.BlockSpec((tm, n_pad), lambda i: (i, 0)),        # A row tile (bf16)
                    pl.BlockSpec((n_pad, out_pad), lambda i: (0, 0)),   # HW resident (bf16)
                    pl.BlockSpec((1, out_pad), lambda i: (0, 0)),       # bmu|bvar
                    pl.BlockSpec((tm, 128), lambda i: (i, 0)),          # eps row tile
                ],
                out_specs=pl.BlockSpec((tm, out_pad), lambda i: (i, 0)),
            ),
            compiler_params=cparams,
        )(a_bf, hw, bmv, eps_p)

    z_mean = packed[:n, 0:z_dim]
    z_scale = packed[:n, z_dim:2 * z_dim]
    z = packed[:n, 2 * z_dim:3 * z_dim]
    return z_mean, z_scale, z


# --------------------------------------------------------------------------- references

def build_norm_adj(edge_index, n):
    """Dense D^-1/2 (A + I) D^-1/2 as used by (cached) GCNConv."""
    src, dst = edge_index[0], edge_index[1]
    loop = jnp.arange(n)
    src = jnp.concatenate([src, loop])
    dst = jnp.concatenate([dst, loop])
    a = jnp.zeros((n, n), jnp.float32).at[dst, src].set(1.0)
    deg = a.sum(axis=1)
    dinv = jnp.where(deg > 0, deg ** -0.5, 0.0)
    return a * dinv[:, None] * dinv[None, :]


def glorot(key, shape):
    fan_in, fan_out = shape
    lim = jnp.sqrt(6.0 / (fan_in + fan_out))
    return jax.random.uniform(key, shape, jnp.float32, -lim, lim)


def reference_forward(a_hat, x, params, eps, mirror_bf16):
    """Pure-JAX reference. mirror_bf16=True mirrors the kernel's bf16 demotions."""
    hp = jax.lax.Precision.HIGHEST
    f32 = jnp.float32
    if mirror_bf16:
        a = a_hat.astype(jnp.bfloat16)
        xw = jnp.dot(x, params["w1"], precision=hp).astype(jnp.bfloat16)
        h = jnp.maximum(jnp.dot(a, xw, preferred_element_type=f32) + params["b1"], 0.0)
        h_bf = h.astype(jnp.bfloat16)
        hw_mu = jnp.dot(h_bf, params["wmu"].astype(jnp.bfloat16),
                        preferred_element_type=f32).astype(jnp.bfloat16)
        hw_var = jnp.dot(h_bf, params["wvar"].astype(jnp.bfloat16),
                         preferred_element_type=f32).astype(jnp.bfloat16)
        mu = jnp.dot(a, hw_mu, preferred_element_type=f32) + params["bmu"]
        raw = jnp.dot(a, hw_var, preferred_element_type=f32) + params["bvar"]
    else:
        h = jnp.maximum(
            jnp.dot(a_hat, jnp.dot(x, params["w1"], precision=hp), precision=hp)
            + params["b1"], 0.0)
        mu = jnp.dot(a_hat, jnp.dot(h, params["wmu"], precision=hp),
                     precision=hp) + params["bmu"]
        raw = jnp.dot(a_hat, jnp.dot(h, params["wvar"], precision=hp),
                      precision=hp) + params["bvar"]
    scale = jax.nn.softplus(raw)
    z = mu + scale * eps
    return mu, scale, z


# --------------------------------------------------------------------------- main

def _run_case(name, n, i_dim, h_dim, z_dim, key):
    kx, k1, k2, k3, ke = jax.random.split(key, 5)

    # deterministic small graph: undirected ring over n nodes
    idx = jnp.arange(n)
    src = jnp.concatenate([idx, (idx + 1) % n])
    dst = jnp.concatenate([(idx + 1) % n, idx])
    edge_index = jnp.stack([src, dst]).astype(jnp.int32)

    x = jax.random.normal(kx, (n, i_dim), jnp.float32)
    a_hat = build_norm_adj(edge_index, n)
    params = {
        "w1":   glorot(k1, (i_dim, h_dim)),
        "b1":   jnp.zeros((1, h_dim), jnp.float32),
        "wmu":  glorot(k2, (h_dim, z_dim)),
        "bmu":  jnp.zeros((1, z_dim), jnp.float32),
        "wvar": glorot(k3, (h_dim, z_dim)),
        "bvar": jnp.zeros((1, z_dim), jnp.float32),
    }
    eps = jax.random.normal(ke, (n, z_dim), jnp.float32)   # reparameterization noise

    z_mean, z_scale, z = model_vae_forward(a_hat, x, params, eps)
    jax.block_until_ready((z_mean, z_scale, z))

    # tight check vs a reference that mirrors the kernel's bf16 demotions
    mu_m, sc_m, z_m = reference_forward(a_hat, x, params, eps, mirror_bf16=True)
    assert jnp.allclose(z_mean, mu_m, atol=1e-3), f"{name}: z_mean mismatch (bf16 mirror)"
    assert jnp.allclose(z_scale, sc_m, atol=1e-3), f"{name}: z_scale mismatch (bf16 mirror)"
    assert jnp.allclose(z, z_m, atol=1e-3), f"{name}: z mismatch (bf16 mirror)"

    # loose check vs the full-f32 module semantics (bf16 storage introduces ~0.5% error)
    mu_f, sc_f, z_f = reference_forward(a_hat, x, params, eps, mirror_bf16=False)
    assert jnp.allclose(z_mean, mu_f, atol=5e-2), f"{name}: z_mean far from f32 reference"
    assert jnp.allclose(z_scale, sc_f, atol=5e-2), f"{name}: z_scale far from f32 reference"
    assert jnp.allclose(z, z_f, atol=5e-2), f"{name}: z far from f32 reference"


if __name__ == "__main__":
    I_DIM, H_DIM, Z_DIM = 32, 64, 16       # GCNEncoder.conv1 hidden fixed at 64
    key = jax.random.PRNGKey(0)
    k_small, k_large = jax.random.split(key, 2)

    _run_case("small-fused", 64, I_DIM, H_DIM, Z_DIM, k_small)      # fused single-call path
    _run_case("large-tiled", 1024, I_DIM, H_DIM, Z_DIM, k_large)    # row-tiled two-call path

    print("KERNEL_OK")
</pallas_src>

<mosaic_0001>
module attributes {stable_mosaic.version = 11 : i64} {
  func.func @gcn_fused_kernel(%arg0: i32, %arg1: memref<128x128xbf16, #tpu.memory_space<vmem>>, %arg2: memref<128x128xbf16, #tpu.memory_space<vmem>>, %arg3: memref<1x128xf32, #tpu.memory_space<vmem>>, %arg4: memref<128x128xbf16, #tpu.memory_space<vmem>>, %arg5: memref<1x128xf32, #tpu.memory_space<vmem>>, %arg6: memref<128x128xf32, #tpu.memory_space<vmem>>, %arg7: memref<128x128xf32, #tpu.memory_space<vmem>>) attributes {dimension_semantics = [#tpu.dimension_semantics<parallel>], iteration_bounds = array<i64: 1>, scalar_prefetch = 0 : i64, scratch_operands = 0 : i64, tpu.core_type = #tpu.core_type<tc>, window_params = [{pipeline_mode = #tpu.pipeline_mode<synchronous>, transform_indices = @transform_0, window_bounds = array<i64: 128, 128>}, {pipeline_mode = #tpu.pipeline_mode<synchronous>, transform_indices = @transform_1, window_bounds = array<i64: 128, 128>}, {pipeline_mode = #tpu.pipeline_mode<synchronous>, transform_indices = @transform_2, window_bounds = array<i64: 1, 128>}, {pipeline_mode = #tpu.pipeline_mode<synchronous>, transform_indices = @transform_3, window_bounds = array<i64: 128, 128>}, {pipeline_mode = #tpu.pipeline_mode<synchronous>, transform_indices = @transform_4, window_bounds = array<i64: 1, 128>}, {pipeline_mode = #tpu.pipeline_mode<synchronous>, transform_indices = @transform_5, window_bounds = array<i64: 128, 128>}, {pipeline_mode = #tpu.pipeline_mode<synchronous>, transform_indices = @transform_6, window_bounds = array<i64: 128, 128>}]} {
    %c0 = arith.constant 0 : index
    %c0_0 = arith.constant 0 : index
    %0 = vector.load %arg1[%c0, %c0_0] : memref<128x128xbf16, #tpu.memory_space<vmem>>, vector<128x128xbf16>
    %c0_1 = arith.constant 0 : index
    %c0_2 = arith.constant 0 : index
    %1 = vector.load %arg2[%c0_1, %c0_2] : memref<128x128xbf16, #tpu.memory_space<vmem>>, vector<128x128xbf16>
    %cst = arith.constant dense<0.000000e+00> : vector<128x128xf32>
    %2 = tpu.matmul %0, %1, %cst {dimension_numbers = #tpu.dot_dimension_numbers<[1], [0], [0], [1], [0, 0, 1, 1], [], []>} : vector<128x128xbf16>, vector<128x128xbf16>, vector<128x128xf32> -> vector<128x128xf32>
    %c0_3 = arith.constant 0 : index
    %c0_4 = arith.constant 0 : index
    %3 = vector.load %arg3[%c0_3, %c0_4] : memref<1x128xf32, #tpu.memory_space<vmem>>, vector<1x128xf32>
    %4 = vector.broadcast %3 : vector<1x128xf32> to vector<128x128xf32>
    %5 = arith.addf %2, %4 : vector<128x128xf32>
    %cst_5 = arith.constant 0.000000e+00 : f32
    %6 = vector.broadcast %cst_5 : f32 to vector<128x128xf32>
    %7 = arith.maximumf %5, %6 : vector<128x128xf32>
    %8 = arith.truncf %7 : vector<128x128xf32> to vector<128x128xbf16>
    %c0_6 = arith.constant 0 : index
    %c0_7 = arith.constant 0 : index
    %9 = vector.load %arg4[%c0_6, %c0_7] : memref<128x128xbf16, #tpu.memory_space<vmem>>, vector<128x128xbf16>
    %cst_8 = arith.constant dense<0.000000e+00> : vector<128x128xf32>
    %10 = tpu.matmul %8, %9, %cst_8 {dimension_numbers = #tpu.dot_dimension_numbers<[1], [0], [0], [1], [0, 0, 1, 1], [], []>} : vector<128x128xbf16>, vector<128x128xbf16>, vector<128x128xf32> -> vector<128x128xf32>
    %11 = arith.truncf %10 : vector<128x128xf32> to vector<128x128xbf16>
    %c0_9 = arith.constant 0 : index
    %c0_10 = arith.constant 0 : index
    %12 = vector.load %arg1[%c0_9, %c0_10] : memref<128x128xbf16, #tpu.memory_space<vmem>>, vector<128x128xbf16>
    %cst_11 = arith.constant dense<0.000000e+00> : vector<128x128xf32>
    %13 = tpu.matmul %12, %11, %cst_11 {dimension_numbers = #tpu.dot_dimension_numbers<[1], [0], [0], [1], [0, 0, 1, 1], [], []>} : vector<128x128xbf16>, vector<128x128xbf16>, vector<128x128xf32> -> vector<128x128xf32>
    %c0_12 = arith.constant 0 : index
    %c0_13 = arith.constant 0 : index
    %14 = vector.load %arg5[%c0_12, %c0_13] : memref<1x128xf32, #tpu.memory_space<vmem>>, vector<1x128xf32>
    %15 = vector.broadcast %14 : vector<1x128xf32> to vector<128x128xf32>
    %16 = arith.addf %13, %15 : vector<128x128xf32>
    %c0_14 = arith.constant 0 : index
    %c0_15 = arith.constant 0 : index
    %17 = vector.load %arg6[%c0_14, %c0_15] : memref<128x128xf32, #tpu.memory_space<vmem>>, vector<128x128xf32>
    %18 = vector.extract_strided_slice %16 {offsets = [0, 0], sizes = [128, 16], strides = [1, 1]} : vector<128x128xf32> to vector<128x16xf32>
    %19 = vector.extract_strided_slice %16 {offsets = [0, 16], sizes = [128, 16], strides = [1, 1]} : vector<128x128xf32> to vector<128x16xf32>
    %cst_16 = arith.constant 0.000000e+00 : f32
    %20 = vector.broadcast %cst_16 : f32 to vector<128x16xf32>
    %21 = arith.maximumf %19, %20 : vector<128x16xf32>
    %22 = math.absf %19 : vector<128x16xf32>
    %cst_17 = arith.constant 0.000000e+00 : f32
    %23 = vector.broadcast %cst_17 : f32 to vector<128x16xf32>
    %24 = arith.subf %23, %22 : vector<128x16xf32>
    %25 = math.exp %24 : vector<128x16xf32>
    %cst_18 = arith.constant 1.000000e+00 : f32
    %26 = vector.broadcast %cst_18 : f32 to vector<128x16xf32>
    %27 = arith.addf %26, %25 : vector<128x16xf32>
    %28 = math.log %27 : vector<128x16xf32>
    %29 = arith.addf %21, %28 : vector<128x16xf32>
    %30 = vector.extract_strided_slice %17 {offsets = [0, 0], sizes = [128, 16], strides = [1, 1]} : vector<128x128xf32> to vector<128x16xf32>
    %31 = arith.mulf %29, %30 : vector<128x16xf32>
    %32 = arith.addf %18, %31 : vector<128x16xf32>
    %cst_19 = arith.constant 0.000000e+00 : f32
    %33 = vector.broadcast %cst_19 : f32 to vector<128x80xf32>
    %34 = tpu.concatenate %18, %29, %32, %33 in 1 : vector<128x16xf32>, vector<128x16xf32>, vector<128x16xf32>, vector<128x80xf32> -> vector<128x128xf32>
    %c0_20 = arith.constant 0 : index
    %c0_21 = arith.constant 0 : index
    %35 = vector.load %arg7[%c0_20, %c0_21] : memref<128x128xf32, #tpu.memory_space<vmem>>, vector<128x128xf32>
    tpu.vector_store %arg7[%c0_20, %c0_21], %34 {strides = array<i32>} : memref<128x128xf32, #tpu.memory_space<vmem>>, vector<128x128xf32>,
    return
  }
  func.func @transform_0(%arg0: i32) -> (i32, i32) {
    %c0_i32 = arith.constant 0 : i32
    %c0_i32_0 = arith.constant 0 : i32
    %c0_i32_1 = arith.constant 0 : i32
    return %c0_i32, %c0_i32_0 : i32, i32
  }
  func.func @transform_1(%arg0: i32) -> (i32, i32) {
    %c0_i32 = arith.constant 0 : i32
    %c0_i32_0 = arith.constant 0 : i32
    %c0_i32_1 = arith.constant 0 : i32
    return %c0_i32, %c0_i32_0 : i32, i32
  }
  func.func @transform_2(%arg0: i32) -> (i32, i32) {
    %c0_i32 = arith.constant 0 : i32
    %c0_i32_0 = arith.constant 0 : i32
    %c0_i32_1 = arith.constant 0 : i32
    return %c0_i32, %c0_i32_0 : i32, i32
  }
  func.func @transform_3(%arg0: i32) -> (i32, i32) {
    %c0_i32 = arith.constant 0 : i32
    %c0_i32_0 = arith.constant 0 : i32
    %c0_i32_1 = arith.constant 0 : i32
    return %c0_i32, %c0_i32_0 : i32, i32
  }
  func.func @transform_4(%arg0: i32) -> (i32, i32) {
    %c0_i32 = arith.constant 0 : i32
    %c0_i32_0 = arith.constant 0 : i32
    %c0_i32_1 = arith.constant 0 : i32
    return %c0_i32, %c0_i32_0 : i32, i32
  }
  func.func @transform_5(%arg0: i32) -> (i32, i32) {
    %c0_i32 = arith.constant 0 : i32
    %c0_i32_0 = arith.constant 0 : i32
    %c0_i32_1 = arith.constant 0 : i32
    return %c0_i32, %c0_i32_0 : i32, i32
  }
  func.func @transform_6(%arg0: i32) -> (i32, i32) {
    %c0_i32 = arith.constant 0 : i32
    %c0_i32_0 = arith.constant 0 : i32
    %c0_i32_1 = arith.constant 0 : i32
    return %c0_i32, %c0_i32_0 : i32, i32
  }
}

</mosaic_0001>

<bundles_post_ra>
// kernel: tpu_custom_call.1
= control target key start
LH: loop header
LB: loop body
LE: loop exit
PB: predicated region body
PF: predicated region fallthrough
CT: control target
= control target key end

     0   :  { %11 = vsyncpa [#allocation3], 0  ;;  %s1860_s0 = inlined_call_operand.hbm [shape: bf16[128,128], index: 0, kind: input, shape index: {}]   ;;  %s1861_s1 = inlined_call_operand.hbm [shape: bf16[128,128], index: 1, kind: input, shape index: {}]   ;;  %s1862_s2 = inlined_call_operand.vmem [shape: f32[1,128], index: 2, kind: input, shape index: {}]   ;;  %s1863_s3 = inlined_call_operand.hbm [shape: bf16[128,128], index: 3, kind: input, shape index: {}]   ;;  %s1864_s4 = inlined_call_operand.vmem [shape: f32[1,128], index: 4, kind: input, shape index: {}]   ;;  %s1865_s5 = inlined_call_operand.hbm [shape: f32[128,128], index: 5, kind: input, shape index: {}]   ;;  %s1866_s6 = inlined_call_operand.hbm [shape: f32[128,128], index: 6, kind: output, shape index: {}]  }
   0x1   :  { %12 = vsyncpa [#allocation6], 0 }
   0x2   :  { %13 = vsyncpa [#allocation9], 0 }
   0x3   :  { %14 = vsyncpa [#allocation4], 0  ;;  %s1473_s21 = smov [#allocation5]   ;;  %s1474_s23 = smov [#allocation2]  }
   0x4   :  { %s32_s22 = sshll.u32 %s1473_s21, 4  ;;  %s20_s24 = sshll.u32 %s1474_s23, 4  ;;  %s33_s22 = int_to_ptr.vmem [resolvable:$true] %s32_s22  ;;  %s21_s24 = int_to_ptr.vmem [resolvable:$true] %s20_s24 }
   0x5   :  { %s1373_s25 = scalar_lea.vmem %s33_s22, 1024  ;;  %p1378_p1 = scmp.lt.s32.totalorder %s33_s22, %s33_s22 }
   0x6   :  { %p1374_p0 = scmp.ne.s32.totalorder %s33_s22, %s1373_s25  ;;  %p1379_p2 = scmp.lt.s32.totalorder %s1373_s25, %s1373_s25 }
   0x8   :  { %p1380_p3 = por %p1379_p2, %p1378_p1 }
   0xa   :  { %p1381_p4 = pnand %p1380_p3, %p1374_p0 }
   0xc   :  { %1384 = shalt.err (!%p1381_p4)
}
   0xd   :  { %s1475_s26 = smov 64   ;;  %s1476_s27 = smov 4  }
   0xe   :  { %38 = dma.hbm_to_vmem [thread:$0]  %s1861_s1, 1024, %s33_s22, [#allocation6], %s1475_s26, %s1475_s26, %s1476_s27  }
   0xf   :  { %s1393_s30 = scalar_lea.vmem %s21_s24, 1024  ;;  %p1398_p6 = scmp.lt.s32.totalorder %s21_s24, %s21_s24 }
  0x10   :  { %p1394_p5 = scmp.ne.s32.totalorder %s21_s24, %s1393_s30  ;;  %p1399_p7 = scmp.lt.s32.totalorder %s1393_s30, %s1393_s30 }
  0x12   :  { %p1400_p8 = por %p1399_p7, %p1398_p6 }
  0x14   :  { %p1401_p9 = pnand %p1400_p8, %p1394_p5 }
  0x16   :  { %1404 = shalt.err (!%p1401_p9)
}
  0x17   :  { %26 = dma.hbm_to_vmem [thread:$0]  %s1860_s0, 1024, %s21_s24, [#allocation3], %s1475_s26, %s1475_s26, %s1476_s27  }
  0x18   :  { %s1477_s9 = smov [#allocation7]   ;;  %s1478_s11 = smov [#allocation8]  }
  0x19   :  { %s46_s10 = sshll.u32 %s1477_s9, 4  ;;  %s60_s12 = sshll.u32 %s1478_s11, 4  ;;  %s47_s10 = int_to_ptr.vmem [resolvable:$true] %s46_s10  ;;  %s61_s12 = int_to_ptr.vmem [resolvable:$true] %s60_s12 }
  0x1a   :  { %s1413_s13 = scalar_lea.vmem %s47_s10, 1024  ;;  %p1418_p11 = scmp.lt.s32.totalorder %s47_s10, %s47_s10 }
  0x1b   :  { %p1414_p10 = scmp.ne.s32.totalorder %s47_s10, %s1413_s13  ;;  %p1419_p12 = scmp.lt.s32.totalorder %s1413_s13, %s1413_s13 }
  0x1d   :  { %p1420_p13 = por %p1419_p12, %p1418_p11 }
  0x1f   :  { %p1421_p0 = pnand %p1420_p13, %p1414_p10 }
  0x21   :  { %1424 = shalt.err (!%p1421_p0)
}
  0x22   :  { %52 = dma.hbm_to_vmem [thread:$0]  %s1863_s3, 1024, %s47_s10, [#allocation6], %s1475_s26, %s1475_s26, %s1476_s27  }
  0x23   :  { %s1433_s15 = scalar_lea.vmem %s61_s12, 2048  ;;  %p1438_p2 = scmp.lt.s32.totalorder %s61_s12, %s61_s12 }
  0x24   :  { %p1434_p1 = scmp.ne.s32.totalorder %s61_s12, %s1433_s15  ;;  %p1439_p3 = scmp.lt.s32.totalorder %s1433_s15, %s1433_s15 }
  0x26   :  { %p1440_p4 = por %p1439_p3, %p1438_p2 }
  0x28   :  { %p1441_p5 = pnand %p1440_p4, %p1434_p1 }
  0x2a   :  { %1444 = shalt.err (!%p1441_p5)
}
  0x2b   :  { %s1479_s0 = smov 128   ;;  %s1480_s16 = smov 8  }
  0x2c   :  { %66 = dma.hbm_to_vmem [thread:$0]  %s1865_s5, 2048, %s61_s12, [#allocation9], %s1479_s0, %s1479_s0, %s1480_s16  }
  0x2d   :  { %1465 = dma.done.wait [#allocation3], 1024  }
  0x2e   :  { %1466 = vsyncadd [#allocation3], 4294966272 }
  0x2f   :  { %1467 = dma.done.wait [#allocation6], 2048  }
  0x30   :  { %1468 = vsyncadd [#allocation6], 4294965248 }
  0x31   :  { %1469 = dma.done.wait [#allocation9], 2048  }
  0x32   :  { %1470 = vsyncadd [#allocation9], 4294965248  ;;  %v1277_v0 = vld [vmem:[#allocation5 + $0x38] sm:$0xff]   ;;  %v1278_v1 = vld [vmem:[#allocation5 + $0x30] sm:$0xff]   ;;  %s1483_s21 = smov 32   ;;  %vm993_vm0 = vcmask 130048  }
  0x33   :  { %1153 = vmatprep.subr.bf16.mxu0 %v1277_v0  ;;  %v1279_v2 = vld [vmem:[#allocation5 + $0x28] sm:$0xff]   ;;  %v1280_v3 = vld [vmem:[#allocation5 + $0x20] sm:$0xff]   ;;  %v1281_v5 = vld [vmem:[#allocation5 + $0x18] sm:$0xff]   ;;  %vm1010_vm1 = vcmask 261120   ;;  %vm1027_vm2 = vcmask 392192   ;;  %s1484_s22 = smov [#allocation10]  }
  0x34   :  { %1154 = vmatpush3.bf16.msra.mxu0 %v1277_v0  ;;  %v1285_v4 = vld [vmem:[#allocation2] sm:$0xff]   ;;  %v1282_v6 = vld [vmem:[#allocation5 + $0x10] sm:$0xff]   ;;  %v1293_v7 = vld [vmem:[#allocation7 + $0x38] sm:$0xff]   ;;  %s1065_s23 = sshll.u32 %s1484_s22, 4  ;;  %s1066_s23 = int_to_ptr.vmem [resolvable:$true] %s1065_s23 }
  0x35   :  { %1155 = vmatprep.subr.bf16.mxu0 %v1278_v1  ;;  %1169 = vmatprep.mubr.bf16.mxu0 %v1285_v4  ;;  %v1294_v8 = vld [vmem:[#allocation7 + $0x30] sm:$0xff]   ;;  %v1283_v9 = vld [vmem:[#allocation5 + $0x8] sm:$0xff]   ;;  %v1284_v11 = vld [vmem:[#allocation5] sm:$0xff]   ;;  %s1445_s24 = scalar_lea.vmem %s1066_s23, 2048  ;;  %p1450_p7 = scmp.lt.s32.totalorder %s1066_s23, %s1066_s23 }
  0x36   :  { %1185 = vmatprep.subr.bf16.mxu1 %v1293_v7  ;;  %v1295_v10 = vld [vmem:[#allocation7 + $0x28] sm:$0xff]   ;;  %v1296_v12 = vld [vmem:[#allocation7 + $0x20] sm:$0xff]   ;;  %v1297_v13 = vld [vmem:[#allocation7 + $0x18] sm:$0xff]   ;;  %p1446_p6 = scmp.ne.s32.totalorder %s1066_s23, %s1445_s24  ;;  %p1451_p8 = scmp.lt.s32.totalorder %s1445_s24, %s1445_s24 }
  0x37   :  { %1186 = vmatpush3.bf16.msra.mxu1 %v1293_v7  ;;  %v1535_v14 = vld [vmem:[#allocation2 + $0x8] sm:$0xff]   ;;  %v1537_v15 = vld [vmem:[#allocation2 + $0x10] sm:$0xff]   ;;  %v1541_v16 = vld [vmem:[#allocation2 + $0x18] sm:$0xff]  }
  0x38   :  { %1156 = vmatpush3.bf16.msra.mxu0 %v1278_v1  ;;  %1187 = vmatprep.subr.bf16.mxu1 %v1294_v8  ;;  %v1543_v17 = vld [vmem:[#allocation2 + $0x20] sm:$0xff]   ;;  %v1547_v18 = vld [vmem:[#allocation2 + $0x28] sm:$0xff]   ;;  %v1549_v19 = vld [vmem:[#allocation2 + $0x30] sm:$0xff]   ;;  %p1452_p9 = por %p1451_p8, %p1450_p7 }
  0x39   :  { %1157 = vmatprep.subr.bf16.mxu0 %v1279_v2  ;;  %v1553_v20 = vld [vmem:[#allocation2 + $0x38] sm:$0xff]   ;;  %v1298_v21 = vld [vmem:[#allocation7 + $0x10] sm:$0xff]   ;;  %v1299_v22 = vld [vmem:[#allocation7 + $0x8] sm:$0xff]  }
  0x3a   :  { %v1300_v23 = vld [vmem:[#allocation7] sm:$0xff]   ;;  %p1453_p10 = pnand %p1452_p9, %p1446_p6 }
  0x3b   :  { %1188 = vmatpush3.bf16.msra.mxu1 %v1294_v8  ;;  %v1079_v26 = vld [vmem:[%s1862_s2] ss:$0 sm:$0xff]  ;;  %s1481_s2 = smov 16  }
  0x3c   :  { %1158 = vmatpush3.bf16.msra.mxu0 %v1279_v2  ;;  %1189 = vmatprep.subr.bf16.mxu1 %v1295_v10 }
  0x3d   :  { %1159 = vmatprep.subr.bf16.mxu0 %v1280_v3 }
  0x3f   :  { %1190 = vmatpush3.bf16.msra.mxu1 %v1295_v10 }
  0x40   :  { %1160 = vmatpush3.bf16.msra.mxu0 %v1280_v3  ;;  %1191 = vmatprep.subr.bf16.mxu1 %v1296_v12 }
  0x41   :  { %1161 = vmatprep.subr.bf16.mxu0 %v1281_v5 }
  0x43   :  { %1192 = vmatpush3.bf16.msra.mxu1 %v1296_v12 }
  0x44   :  { %1162 = vmatpush3.bf16.msra.mxu0 %v1281_v5  ;;  %1193 = vmatprep.subr.bf16.mxu1 %v1297_v13 }
  0x45   :  { %1163 = vmatprep.subr.bf16.mxu0 %v1282_v6 }
  0x47   :  { %1194 = vmatpush3.bf16.msra.mxu1 %v1297_v13 }
  0x48   :  { %1164 = vmatpush3.bf16.msra.mxu0 %v1282_v6  ;;  %1195 = vmatprep.subr.bf16.mxu1 %v1298_v21 }
  0x49   :  { %1165 = vmatprep.subr.bf16.mxu0 %v1283_v9 }
  0x4b   :  { %1196 = vmatpush3.bf16.msra.mxu1 %v1298_v21 }
  0x4c   :  { %1166 = vmatpush3.bf16.msra.mxu0 %v1283_v9  ;;  %1197 = vmatprep.subr.bf16.mxu1 %v1299_v22 }
  0x4d   :  { %1167 = vmatprep.subr.bf16.mxu0 %v1284_v11 }
  0x4f   :  { %1198 = vmatpush3.bf16.msra.mxu1 %v1299_v22 }
  0x50   :  { %1168 = vmatpush3.bf16.msra.mxu0 %v1284_v11  ;;  %1199 = vmatprep.subr.bf16.mxu1 %v1300_v23 }
  0x53   :  { %1170 = vmatmul.mubr.bf16.vlgmr.msra.gmra.mxu0 %v1535_v14  ;;  %1200 = vmatpush3.bf16.msra.mxu1 %v1300_v23 }
  0x54   :  { %1173 = vmatprep.mubr.bf16.mxu0 %v1537_v15 }
  0x5b   :  { %1174 = vmatmul.mubr.bf16.gmra.mxu0 %v1541_v16 }
  0x5c   :  { %1177 = vmatprep.mubr.bf16.mxu0 %v1543_v17 }
  0x63   :  { %1178 = vmatmul.mubr.bf16.gmra.mxu0 %v1547_v18 }
  0x64   :  { %1181 = vmatprep.mubr.bf16.mxu0 %v1549_v19 }
  0x6b   :  { %1182 = vmatmul.mubr.bf16.gmra.mxu0 %v1553_v20 }
  0x6c   :  { %1233 = vmatprep.mubr.bf16.mxu0 %v1285_v4 }
 0x113   :  { %v1171_v24 = vpop.f32.mrf.mxu0 }
 0x114   :  { %v258_v30 = vadd.f32 %v1171_v24, %v1079_v26  ;;  %v609_v24 = vld [vmem:[#allocation8] sm:$0xff] }
 0x115   :  { %v249_v25 = vpop.f32.mrf.mxu0  ;;  %785 = vrot.lane.b32.xlu0 %v609_v24, %s1481_s2 }
 0x116   :  { %v250_v28 = vadd.f32 %v1079_v26, %v249_v25  ;;  %v314_v37 = vmax.f32 %v258_v30, 0.0  ;;  %v611_v25 = vld [vmem:[#allocation8 + $0x10] sm:$0xff] }
 0x117   :  { %v1172_v27 = vpop.f32.mrf.mxu0  ;;  %789 = vrot.lane.b32.xlu1 %v611_v25, %s1481_s2  ;;  %v615_v30 = vld [vmem:[#allocation8 + $0x30] sm:$0xff] }
 0x118   :  { %v261_v29 = vadd.f32 %v1172_v27, %v1079_v26  ;;  %v312_v35 = vmax.f32 %v250_v28, 0.0  ;;  %v610_v27 = vld [vmem:[#allocation8 + $0x8] sm:$0xff]  ;;  %v612_v28 = vld [vmem:[#allocation8 + $0x18] sm:$0xff] }
 0x119   :  { %v252_v31 = vpop.f32.mrf.mxu0  ;;  %787 = vrot.lane.b32.xlu0 %v610_v27, %s1481_s2 }
 0x11a   :  { %v253_v32 = vadd.f32 %v1079_v26, %v252_v31  ;;  %v315_v33 = vmax.f32 %v261_v29, 0.0  ;;  %v614_v29 = vld [vmem:[#allocation8 + $0x28] sm:$0xff]  ;;  %v616_v31 = vld [vmem:[#allocation8 + $0x38] sm:$0xff] }
 0x11b   :  { %v1175_v34 = vpop.f32.mrf.mxu0  ;;  %791 = vrot.lane.b32.xlu1 %v612_v28, %s1481_s2 }
 0x11c   :  { %v313_v36 = vmax.f32 %v253_v32, 0.0  ;;  %v329_v40 = vpack.c.bf16 %v315_v33, %v314_v37  ;;  %v274_v44 = vadd.f32 %v1175_v34, %v1079_v26  ;;  %v617_v32 = vld [vmem:[#allocation8 + $0x40] sm:$0xff]  ;;  %v618_v33 = vld [vmem:[#allocation8 + $0x48] sm:$0xff]  ;;  %v620_v34 = vld [vmem:[#allocation8 + $0x58] sm:$0xff] }
 0x11d   :  { %v265_v38 = vpop.f32.mrf.mxu0  ;;  %v623_v37 = vld [vmem:[#allocation8 + $0x70] sm:$0xff] }
 0x11e   :  { %v328_v39 = vpack.c.bf16 %v313_v36, %v312_v35  ;;  %v266_v42 = vadd.f32 %v1079_v26, %v265_v38  ;;  %v318_v51 = vmax.f32 %v274_v44, 0.0  ;;  %v621_v35 = vld [vmem:[#allocation8 + $0x60] sm:$0xff]  ;;  %v622_v36 = vld [vmem:[#allocation8 + $0x68] sm:$0xff]  ;;  %v624_v38 = vld [vmem:[#allocation8 + $0x78] sm:$0xff] }
 0x11f   :  { %v1176_v41 = vpop.f32.mrf.mxu0  ;;  %795 = vrot.lane.b32.xlu1 %v614_v29, %s1481_s2 }
 0x120   :  { %v277_v43 = vadd.f32 %v1176_v41, %v1079_v26  ;;  %1201 = vmatprep.mubr.bf16.mxu1 %v328_v39  ;;  %v316_v49 = vmax.f32 %v266_v42, 0.0 }
 0x121   :  { %v268_v45 = vpop.f32.mrf.mxu0  ;;  %1202 = vmatmul.mubr.bf16.vlgmr.msra.gmra.mxu1 %v329_v40 }
 0x122   :  { %v269_v46 = vadd.f32 %v1079_v26, %v268_v45  ;;  %v319_v47 = vmax.f32 %v277_v43, 0.0 }
 0x123   :  { %v1179_v48 = vpop.f32.mrf.mxu0  ;;  %799 = vrot.lane.b32.xlu1 %v616_v31, %s1481_s2 }
 0x124   :  { %v317_v50 = vmax.f32 %v269_v46, 0.0  ;;  %v331_v54 = vpack.c.bf16 %v319_v47, %v318_v51  ;;  %v290_v58 = vadd.f32 %v1179_v48, %v1079_v26 }
 0x125   :  { %v281_v52 = vpop.f32.mrf.mxu0 }
 0x126   :  { %v330_v53 = vpack.c.bf16 %v317_v50, %v316_v49  ;;  %v282_v56 = vadd.f32 %v1079_v26, %v281_v52  ;;  %v322_v1 = vmax.f32 %v290_v58, 0.0 }
 0x127   :  { %v1180_v55 = vpop.f32.mrf.mxu0  ;;  %803 = vrot.lane.b32.xlu1 %v618_v33, %s1481_s2 }
 0x128   :  { %v293_v57 = vadd.f32 %v1180_v55, %v1079_v26  ;;  %1205 = vmatprep.mubr.bf16.mxu1 %v330_v53  ;;  %v320_v63 = vmax.f32 %v282_v56, 0.0 }
 0x129   :  { %v284_v59 = vpop.f32.mrf.mxu0  ;;  %1206 = vmatmul.mubr.bf16.gmra.mxu1 %v331_v54 }
 0x12a   :  { %v285_v60 = vadd.f32 %v1079_v26, %v284_v59  ;;  %v323_v61 = vmax.f32 %v293_v57, 0.0 }
 0x12b   :  { %v1183_v62 = vpop.f32.mrf.mxu0  ;;  %807 = vrot.lane.b32.xlu1 %v620_v34, %s1481_s2 }
 0x12c   :  { %v321_v0 = vmax.f32 %v285_v60, 0.0  ;;  %v333_v4 = vpack.c.bf16 %v323_v61, %v322_v1  ;;  %v306_v8 = vadd.f32 %v1183_v62, %v1079_v26 }
 0x12d   :  { %v297_v2 = vpop.f32.mrf.mxu0 }
 0x12e   :  { %v332_v3 = vpack.c.bf16 %v321_v0, %v320_v63  ;;  %v298_v6 = vadd.f32 %v1079_v26, %v297_v2  ;;  %v326_v21 = vmax.f32 %v306_v8, 0.0  ;;  %v1569_v63 = vld [vmem:[%s1864_s4] ss:$0 sm:$0xff]  ;;  %s1482_s4 = smov 112  }
 0x12f   :  { %v1184_v5 = vpop.f32.mrf.mxu0  ;;  %811 = vrot.lane.b32.xlu1 %v622_v36, %s1481_s2 }
 0x130   :  { %v309_v7 = vadd.f32 %v1184_v5, %v1079_v26  ;;  %1209 = vmatprep.mubr.bf16.mxu1 %v332_v3  ;;  %v324_v12 = vmax.f32 %v298_v6, 0.0 }
 0x131   :  { %v300_v9 = vpop.f32.mrf.mxu0  ;;  %1210 = vmatmul.mubr.bf16.gmra.mxu1 %v333_v4 }
 0x132   :  { %v301_v10 = vadd.f32 %v1079_v26, %v300_v9  ;;  %v327_v11 = vmax.f32 %v309_v7, 0.0  ;;  %v613_v26 = vld [vmem:[#allocation8 + $0x20] sm:$0xff] }
 0x133   :  { %793 = vrot.lane.b32.xlu0 %v613_v26, %s1481_s2  ;;  %815 = vrot.lane.b32.xlu1 %v624_v38, %s1481_s2 }
 0x134   :  { %v325_v13 = vmax.f32 %v301_v10, 0.0  ;;  %v335_v23 = vpack.c.bf16 %v327_v11, %v326_v21 }
 0x136   :  { %v334_v22 = vpack.c.bf16 %v325_v13, %v324_v12 }
 0x137   :  { %797 = vrot.lane.b32.xlu0 %v615_v30, %s1481_s2 }
 0x138   :  { %1213 = vmatprep.mubr.bf16.mxu1 %v334_v22 }
 0x139   :  { %1214 = vmatmul.mubr.bf16.gmra.mxu1 %v335_v23 }
 0x13a   :  { %1241 = vmatprep.mubr.bf16.mxu1 %v1543_v17  ;;  %v619_v17 = vld [vmem:[#allocation8 + $0x50] sm:$0xff] }
 0x13b   :  { %801 = vrot.lane.b32.xlu0 %v617_v32, %s1481_s2 }
 0x13f   :  { %805 = vrot.lane.b32.xlu0 %v619_v17, %s1481_s2 }
 0x143   :  { %809 = vrot.lane.b32.xlu0 %v621_v35, %s1481_s2 }
 0x147   :  { %813 = vrot.lane.b32.xlu0 %v623_v37, %s1481_s2 }
 0x1e1   :  { %v1203_v39 = vpop.f32.mrf.mxu1 }
 0x1e3   :  { %v434_v40 = vpop.f32.mrf.mxu1 }
 0x1e5   :  { %v1204_v41 = vpop.f32.mrf.mxu1 }
 0x1e6   :  { %v498_v61 = vpack.c.bf16 %v1204_v41, %v1203_v39 }
 0x1e7   :  { %v437_v42 = vpop.f32.mrf.mxu1 }
 0x1e8   :  { %v497_v62 = vpack.c.bf16 %v437_v42, %v434_v40 }
 0x1e9   :  { %v1207_v43 = vpop.f32.mrf.mxu1 }
 0x1eb   :  { %v450_v44 = vpop.f32.mrf.mxu1 }
 0x1ed   :  { %v1208_v45 = vpop.f32.mrf.mxu1 }
 0x1ee   :  { %v500_v59 = vpack.c.bf16 %v1208_v45, %v1207_v43 }
 0x1ef   :  { %v453_v46 = vpop.f32.mrf.mxu1 }
 0x1f0   :  { %v499_v60 = vpack.c.bf16 %v453_v46, %v450_v44 }
 0x1f1   :  { %v1211_v47 = vpop.f32.mrf.mxu1 }
 0x1f3   :  { %v466_v48 = vpop.f32.mrf.mxu1 }
 0x1f5   :  { %v1212_v49 = vpop.f32.mrf.mxu1 }
 0x1f6   :  { %v502_v57 = vpack.c.bf16 %v1212_v49, %v1211_v47 }
 0x1f7   :  { %v469_v50 = vpop.f32.mrf.mxu1 }
 0x1f8   :  { %v501_v58 = vpack.c.bf16 %v469_v50, %v466_v48 }
 0x1f9   :  { %v1215_v51 = vpop.f32.mrf.mxu1 }
 0x1fb   :  { %v482_v52 = vpop.f32.mrf.mxu1 }
 0x1fd   :  { %v1216_v53 = vpop.f32.mrf.mxu1 }
 0x1fe   :  { %v504_v54 = vpack.c.bf16 %v1216_v53, %v1215_v51 }
 0x1ff   :  { %v485_v55 = vpop.f32.mrf.mxu1 }
 0x200   :  { %v503_v56 = vpack.c.bf16 %v485_v55, %v482_v52  ;;  %1217 = vmatprep.subr.bf16.mxu0 %v504_v54  ;;  %1249 = vmatprep.subr.bf16.mxu1 %v504_v54 }
 0x201   :  { %1218 = vmatpush3.bf16.msra.mxu0 %v504_v54  ;;  %1257 = vmatpush3.bf16.msra.mxu1 %v504_v54 }
 0x202   :  { %1219 = vmatprep.subr.bf16.mxu0 %v503_v56  ;;  %1250 = vmatprep.subr.bf16.mxu1 %v503_v56 }
 0x205   :  { %1220 = vmatpush3.bf16.msra.mxu0 %v503_v56  ;;  %1258 = vmatpush3.bf16.msra.mxu1 %v503_v56 }
 0x206   :  { %1221 = vmatprep.subr.bf16.mxu0 %v502_v57  ;;  %1251 = vmatprep.subr.bf16.mxu1 %v502_v57 }
 0x209   :  { %1222 = vmatpush3.bf16.msra.mxu0 %v502_v57  ;;  %1259 = vmatpush3.bf16.msra.mxu1 %v502_v57 }
 0x20a   :  { %1223 = vmatprep.subr.bf16.mxu0 %v501_v58  ;;  %1252 = vmatprep.subr.bf16.mxu1 %v501_v58 }
 0x20d   :  { %1224 = vmatpush3.bf16.msra.mxu0 %v501_v58  ;;  %1260 = vmatpush3.bf16.msra.mxu1 %v501_v58 }
 0x20e   :  { %1225 = vmatprep.subr.bf16.mxu0 %v500_v59  ;;  %1253 = vmatprep.subr.bf16.mxu1 %v500_v59 }
 0x211   :  { %1226 = vmatpush3.bf16.msra.mxu0 %v500_v59  ;;  %1261 = vmatpush3.bf16.msra.mxu1 %v500_v59 }
 0x212   :  { %1227 = vmatprep.subr.bf16.mxu0 %v499_v60  ;;  %1254 = vmatprep.subr.bf16.mxu1 %v499_v60 }
 0x215   :  { %1228 = vmatpush3.bf16.msra.mxu0 %v499_v60  ;;  %1262 = vmatpush3.bf16.msra.mxu1 %v499_v60 }
 0x216   :  { %1229 = vmatprep.subr.bf16.mxu0 %v498_v61  ;;  %1255 = vmatprep.subr.bf16.mxu1 %v498_v61 }
 0x219   :  { %1230 = vmatpush3.bf16.msra.mxu0 %v498_v61  ;;  %1263 = vmatpush3.bf16.msra.mxu1 %v498_v61 }
 0x21a   :  { %1231 = vmatprep.subr.bf16.mxu0 %v497_v62  ;;  %1256 = vmatprep.subr.bf16.mxu1 %v497_v62 }
 0x21d   :  { %1232 = vmatpush3.bf16.msra.mxu0 %v497_v62  ;;  %1264 = vmatpush3.bf16.msra.mxu1 %v497_v62 }
 0x220   :  { %1234 = vmatmul.mubr.bf16.vlgmr.msra.gmra.mxu0 %v1535_v14  ;;  %1242 = vmatmul.mubr.bf16.vlgmr.msra.gmra.mxu1 %v1547_v18 }
 0x221   :  { %1237 = vmatprep.mubr.bf16.mxu0 %v1537_v15  ;;  %1245 = vmatprep.mubr.bf16.mxu1 %v1549_v19 }
 0x228   :  { %1238 = vmatmul.mubr.bf16.gmra.mxu0 %v1541_v16  ;;  %1246 = vmatmul.mubr.bf16.gmra.mxu1 %v1553_v20 }
 0x2e0   :  { %v1235_v0 = vpop.f32.mrf.mxu0  ;;  %v1243_v1 = vpop.f32.mrf.mxu1 }
 0x2e1   :  { %v1572_v2 = vadd.f32 %v1235_v0, %v1569_v63  ;;  %v1575_v14 = vadd.f32 %v1243_v1, %v1569_v63 }
 0x2e2   :  { %v546_v15 = vpop.f32.mrf.mxu0  ;;  %v578_v18 = vpop.f32.mrf.mxu1 }
 0x2e3   :  { %v643_v19 = vand.u32 2147483647, %v1572_v2  ;;  %v651_v16 = vand.u32 2147483647, %v1575_v14  ;;  %v1580_v20 = vadd.f32 %v1569_v63, %v546_v15  ;;  %v1583_v3 = vadd.f32 %v1569_v63, %v578_v18 }
 0x2e4   :  { %v1236_v4 = vpop.f32.mrf.mxu0  ;;  %v1244_v5 = vpop.f32.mrf.mxu1 }
 0x2e5   :  { %v659_v6 = vsub.f32 0.0, %v643_v19  ;;  %v667_v7 = vsub.f32 0.0, %v651_v16  ;;  %v641_v8 = vand.u32 2147483647, %v1580_v20  ;;  %v649_v9 = vand.u32 2147483647, %v1583_v3 }
 0x2e6   :  { %v1588_v10 = vadd.f32 %v1236_v4, %v1569_v63  ;;  %v1591_v11 = vadd.f32 %v1244_v5, %v1569_v63  ;;  %v549_v12 = vpop.f32.mrf.mxu0  ;;  %v581_v13 = vpop.f32.mrf.mxu1 }
 0x2e7   :  { %v677_v21 = vmul.f32 1.442695, %v659_v6  ;;  %v693_v22 = vmul.f32 1.442695, %v667_v7  ;;  %v657_v23 = vsub.f32 0.0, %v641_v8  ;;  %v665_v24 = vsub.f32 0.0, %v649_v9  ;;  %v1634_v4 = vpop.permute.xlu0 %785  ;;  %v1637_v8 = vpop.permute.xlu1 %789 }
 0x2e8   :  { %v644_v25 = vand.u32 2147483647, %v1588_v10  ;;  %v652_v27 = vand.u32 2147483647, %v1591_v11  ;;  %v1596_v28 = vadd.f32 %v1569_v63, %v549_v12  ;;  %v1599_v26 = vadd.f32 %v1569_v63, %v581_v13  ;;  %v1239_v29 = vpop.f32.mrf.mxu0  ;;  %v1247_v30 = vpop.f32.mrf.mxu1 }
 0x2e9   :  { %1301 = vpow2.f32 %v677_v21  ;;  %v673_v31 = vmul.f32 1.442695, %v657_v23  ;;  %v1602_v32 = vadd.f32 %v1239_v29, %v1569_v63  ;;  %v689_v37 = vmul.f32 1.442695, %v665_v24 }
 0x2ea   :  { %v660_v33 = vsub.f32 0.0, %v644_v25  ;;  %v668_v17 = vsub.f32 0.0, %v652_v27  ;;  %v642_v34 = vand.u32 2147483647, %v1596_v28  ;;  %v562_v35 = vpop.f32.mrf.mxu0  ;;  %v594_v36 = vpop.f32.mrf.mxu1  ;;  %v650_v38 = vand.u32 2147483647, %v1599_v26 }
 0x2eb   :  { %v647_v39 = vand.u32 2147483647, %v1602_v32  ;;  %1303 = vpow2.f32 %v693_v22  ;;  %v1608_v47 = vadd.f32 %v1569_v63, %v562_v35  ;;  %v1611_v49 = vadd.f32 %v1569_v63, %v594_v36  ;;  %v1639_v29 = vpop.permute.xlu0 %787 }
 0x2ec   :  { %v679_v40 = vmul.f32 1.442695, %v660_v33  ;;  %v695_v41 = vmul.f32 1.442695, %v668_v17  ;;  %v658_v42 = vsub.f32 0.0, %v642_v34  ;;  %v1240_v43 = vpop.f32.mrf.mxu0  ;;  %v1248_v44 = vpop.f32.mrf.mxu1  ;;  %1305 = vpow2.f32 %v673_v31 }
 0x2ed   :  { %v666_v45 = vsub.f32 0.0, %v650_v38  ;;  %v663_v46 = vsub.f32 0.0, %v647_v39  ;;  %v1614_v50 = vadd.f32 %v1240_v43, %v1569_v63  ;;  %v1617_v53 = vadd.f32 %v1247_v30, %v1569_v63  ;;  %v792_v33 = vpop.permute.xlu1 %791 }
 0x2ee   :  { %1307 = vpow2.f32 %v679_v40  ;;  %v675_v48 = vmul.f32 1.442695, %v658_v42  ;;  %v565_v51 = vpop.f32.mrf.mxu0  ;;  %v645_v54 = vand.u32 2147483647, %v1608_v47  ;;  %v653_v55 = vand.u32 2147483647, %v1611_v49  ;;  %v597_v57 = vpop.f32.mrf.mxu1 }
 0x2ef   :  { %1309 = vpow2.f32 %v695_v41  ;;  %v691_v52 = vmul.f32 1.442695, %v666_v45  ;;  %v648_v56 = vand.u32 2147483647, %v1614_v50  ;;  %v685_v58 = vmul.f32 1.442695, %v663_v46  ;;  %v1641_v42 = vpop.permute.xlu0 %793 }
 0x2f0   :  { %1311 = vpow2.f32 %v675_v48  ;;  %v1623_v59 = vadd.f32 %v1248_v44, %v1569_v63  ;;  %v1626_v60 = vadd.f32 %v1569_v63, %v565_v51  ;;  %v661_v61 = vsub.f32 0.0, %v645_v54 }
 0x2f1   :  { %1313 = vpow2.f32 %v689_v37  ;;  %v664_v62 = vsub.f32 0.0, %v648_v56  ;;  %v655_v0 = vand.u32 2147483647, %v1617_v53  ;;  %v669_v1 = vsub.f32 0.0, %v653_v55  ;;  %v1643_v44 = vpop.permute.xlu1 %795 }
 0x2f2   :  { %1315 = vpow2.f32 %v691_v52  ;;  %v646_v15 = vand.u32 2147483647, %v1626_v60  ;;  %v1631_v18 = vadd.f32 %v1569_v63, %v597_v57  ;;  %v656_v16 = vand.u32 2147483647, %v1623_v59 }
 0x2f3   :  { %v687_v19 = vmul.f32 1.442695, %v664_v62  ;;  %1317 = vpow2.f32 %v685_v58  ;;  %v681_v5 = vmul.f32 1.442695, %v661_v61  ;;  %v671_v12 = vsub.f32 0.0, %v655_v0  ;;  %v1645_v55 = vpop.permute.xlu0 %797 }
 0x2f4   :  { %v662_v6 = vsub.f32 0.0, %v646_v15  ;;  %v654_v7 = vand.u32 2147483647, %v1631_v18  ;;  %v697_v13 = vmul.f32 1.442695, %v669_v1  ;;  %v672_v63 = vsub.f32 0.0, %v656_v16 }
 0x2f5   :  { %1319 = vpow2.f32 %v687_v19  ;;  %v701_v31 = vmul.f32 1.442695, %v671_v12  ;;  %v1647_v58 = vpop.permute.xlu1 %799  ;;  %v627_v16 = vmax.f32 %v1572_v2, 0.0 }
 0x2f6   :  { %v1302_v9 = vpop.eup %1301  ;;  %v683_v21 = vmul.f32 1.442695, %v662_v6  ;;  %v670_v22 = vsub.f32 0.0, %v654_v7  ;;  %1321 = vpow2.f32 %v681_v5  ;;  %v703_v34 = vmul.f32 1.442695, %v672_v63 }
 0x2f7   :  { %v707_v25 = vadd.f32 1.0, %v1302_v9  ;;  %v628_v7 = vmax.f32 %v1588_v10, 0.0  ;;  %v1651_v12 = vpop.permute.xlu0 %801 }
 0x2f8   :  { %v1304_v23 = vpop.eup %1303  ;;  %v699_v24 = vmul.f32 1.442695, %v670_v22  ;;  %1323 = vpow2.f32 %v683_v21 }
 0x2f9   :  { %v1306_v27 = vpop.eup %1305  ;;  %1325 = vpow2.f32 %v697_v13  ;;  %v715_v41 = vadd.f32 1.0, %v1304_v23  ;;  %v1655_v22 = vpop.permute.xlu1 %803 }
 0x2fa   :  { %1327 = vpow2.f32 %v699_v24  ;;  %v705_v37 = vadd.f32 1.0, %v1306_v27 }
 0x2fb   :  { %v1308_v30 = vpop.eup %1307  ;;  %1329 = vlog2.f32 %v707_v25 }
 0x2fc   :  { %v1310_v17 = vpop.eup %1309  ;;  %v708_v35 = vadd.f32 1.0, %v1308_v30 }
 0x2fd   :  { %v1312_v36 = vpop.eup %1311  ;;  %v716_v43 = vadd.f32 1.0, %v1310_v17 }
 0x2fe   :  { %v1314_v38 = vpop.eup %1313  ;;  %v706_v39 = vadd.f32 1.0, %v1312_v36  ;;  %1331 = vlog2.f32 %v708_v35  ;;  %v636_v35 = vmax.f32 %v1591_v11, 0.0 }
 0x2ff   :  { %v1316_v40 = vpop.eup %1315  ;;  %1333 = vpow2.f32 %v701_v31  ;;  %v713_v45 = vadd.f32 1.0, %v1314_v38 }
 0x300   :  { %1335 = vpow2.f32 %v703_v34  ;;  %v1318_v46 = vpop.eup %1317  ;;  %v714_v48 = vadd.f32 1.0, %v1316_v40  ;;  %v635_v34 = vmax.f32 %v1575_v14, 0.0 }
 0x301   :  { %1337 = vlog2.f32 %v705_v37  ;;  %v711_v52 = vadd.f32 1.0, %v1318_v46  ;;  %v625_v46 = vmax.f32 %v1580_v20, 0.0 }
 0x302   :  { %1339 = vlog2.f32 %v706_v39  ;;  %v1320_v51 = vpop.eup %1319 }
 0x303   :  { %1341 = vlog2.f32 %v715_v41  ;;  %v1322_v54 = vpop.eup %1321  ;;  %v712_v56 = vadd.f32 1.0, %v1320_v51  ;;  %v808_v51 = vpop.permute.xlu1 %807 }
 0x304   :  { %1343 = vlog2.f32 %v716_v43  ;;  %v709_v0 = vadd.f32 1.0, %v1322_v54  ;;  %v806_v43 = vpop.permute.xlu0 %805 }
 0x305   :  { %1345 = vlog2.f32 %v713_v45  ;;  %v1324_v57 = vpop.eup %1323 }
 0x306   :  { %1347 = vlog2.f32 %v714_v48  ;;  %v1326_v61 = vpop.eup %1325  ;;  %v710_v15 = vadd.f32 1.0, %v1324_v57 }
 0x307   :  { %v1328_v62 = vpop.eup %1327  ;;  %1349 = vlog2.f32 %v711_v52  ;;  %v717_v63 = vadd.f32 1.0, %v1326_v61  ;;  %v626_v52 = vmax.f32 %v1596_v28, 0.0 }
 0x308   :  { %v1330_v1 = vpop.eup %1329  ;;  %1351 = vlog2.f32 %v712_v56  ;;  %v718_v25 = vadd.f32 1.0, %v1328_v62 }
 0x309   :  { %v726_v5 = vmul.f32 0.6931472, %v1330_v1  ;;  %1353 = vlog2.f32 %v709_v0 }
 0x30a   :  { %1355 = vlog2.f32 %v710_v15 }
 0x30b   :  { %v1332_v19 = vpop.eup %1331  ;;  %v1653_v21 = vadd.f32 %v726_v5, %v627_v16  ;;  %1357 = vlog2.f32 %v717_v63  ;;  %v633_v16 = vmax.f32 %v1583_v3, 0.0  ;;  %v634_v5 = vmax.f32 %v1599_v26, 0.0 }
 0x30c   :  { %v1334_v6 = vpop.eup %1333  ;;  %v728_v9 = vmul.f32 0.6931472, %v1332_v19  ;;  %1359 = vlog2.f32 %v718_v25 }
 0x30d   :  { %v1336_v13 = vpop.eup %1335  ;;  %v835_v30 = vmul.f32 %v1637_v8, %v1653_v21  ;;  %v719_v39 = vadd.f32 1.0, %v1334_v6 }
 0x30e   :  { %v1338_v23 = vpop.eup %1337  ;;  %v1657_v24 = vadd.f32 %v728_v9, %v628_v7  ;;  %v720_v8 = vadd.f32 1.0, %v1336_v13 }
 0x30f   :  { %v1340_v27 = vpop.eup %1339  ;;  %v722_v37 = vmul.f32 0.6931472, %v1338_v23  ;;  %869 = vrot.lane.b32.xlu0 %v835_v30, %s1482_s4  ;;  %1361 = vlog2.f32 %v719_v39  ;;  %v631_v30 = vmax.f32 %v1602_v32, 0.0  ;;  %v629_v39 = vmax.f32 %v1608_v47, 0.0 }
 0x310   :  { %v1342_v31 = vpop.eup %1341  ;;  %v836_v17 = vmul.f32 %v792_v33, %v1657_v24  ;;  %v724_v41 = vmul.f32 0.6931472, %v1340_v27  ;;  %1363 = vlog2.f32 %v720_v8 }
 0x311   :  { %v1344_v36 = vpop.eup %1343  ;;  %v742_v38 = vmul.f32 0.6931472, %v1342_v31  ;;  %v1672_v56 = vadd.f32 %v722_v37, %v625_v46  ;;  %v632_v31 = vmax.f32 %v1614_v50, 0.0 }
 0x312   :  { %v1346_v40 = vpop.eup %1345  ;;  %v744_v45 = vmul.f32 0.6931472, %v1344_v36  ;;  %871 = vrot.lane.b32.xlu1 %v836_v17, %s1482_s4  ;;  %v1675_v0 = vadd.f32 %v724_v41, %v626_v52  ;;  %v810_v52 = vpop.permute.xlu0 %809 }
 0x313   :  { %v1348_v33 = vpop.eup %1347  ;;  %v1667_v48 = vadd.f32 %v742_v38, %v635_v34  ;;  %v738_v57 = vmul.f32 0.6931472, %v1346_v40  ;;  %v833_v6 = vmul.f32 %v1634_v4, %v1672_v56  ;;  %v630_v40 = vmax.f32 %v1626_v60, 0.0 }
 0x314   :  { %v1670_v54 = vadd.f32 %v744_v45, %v636_v35  ;;  %v1350_v62 = vpop.eup %1349  ;;  %v740_v1 = vmul.f32 0.6931472, %v1348_v33  ;;  %v834_v63 = vmul.f32 %v1639_v29, %v1675_v0 }
 0x315   :  { %v843_v61 = vmul.f32 %v806_v43, %v1667_v48  ;;  %v1352_v19 = vpop.eup %1351  ;;  %v734_v7 = vmul.f32 0.6931472, %v1350_v62  ;;  %v1684_v9 = vadd.f32 %v738_v57, %v633_v16  ;;  %v638_v57 = vmax.f32 %v1631_v18, 0.0  ;;  %v812_v62 = vpop.permute.xlu1 %811 }
 0x316   :  { %v844_v15 = vmul.f32 %v808_v51, %v1670_v54  ;;  %v1354_v13 = vpop.eup %1353  ;;  %v736_v23 = vmul.f32 0.6931472, %v1352_v19  ;;  %v1688_v25 = vadd.f32 %v740_v1, %v634_v5  ;;  %v637_v51 = vmax.f32 %v1611_v49, 0.0 }
 0x317   :  { %885 = vrot.lane.b32.xlu0 %v843_v61, %s1482_s4  ;;  %v1356_v27 = vpop.eup %1355  ;;  %v730_v4 = vmul.f32 0.6931472, %v1354_v13  ;;  %v1694_v17 = vadd.f32 %v734_v7, %v631_v30  ;;  %v841_v34 = vmul.f32 %v1651_v12, %v1684_v9  ;;  %v639_v16 = vmax.f32 %v1617_v53, 0.0  ;;  %v814_v13 = vpop.permute.xlu0 %813 }
 0x318   :  { %887 = vrot.lane.b32.xlu1 %v844_v15, %s1482_s4  ;;  %v1358_v35 = vpop.eup %1357  ;;  %v732_v29 = vmul.f32 0.6931472, %v1356_v27  ;;  %v1698_v36 = vadd.f32 %v736_v23, %v632_v31  ;;  %v842_v37 = vmul.f32 %v1655_v22, %v1688_v25  ;;  %v640_v5 = vmax.f32 %v1623_v59, 0.0 }
 0x319   :  { %v1360_v38 = vpop.eup %1359  ;;  %v1706_v41 = vadd.f32 %v730_v4, %v629_v39  ;;  %v839_v12 = vmul.f32 %v1645_v55, %v1694_v17  ;;  %v746_v43 = vmul.f32 0.6931472, %v1358_v35 }
 0x31a   :  { %v1710_v8 = vadd.f32 %v732_v29, %v630_v40  ;;  %v840_v22 = vmul.f32 %v1647_v58, %v1698_v36  ;;  %v748_v33 = vmul.f32 0.6931472, %v1360_v38 }
 0x31b   :  { %865 = vrot.lane.b32.xlu0 %v833_v6, %s1482_s4  ;;  %v837_v55 = vmul.f32 %v1641_v42, %v1706_v41  ;;  %v1720_v61 = vadd.f32 %v746_v43, %v637_v51 }
 0x31c   :  { %867 = vrot.lane.b32.xlu1 %v834_v63, %s1482_s4  ;;  %v1362_v45 = vpop.eup %1361  ;;  %v838_v58 = vmul.f32 %v1643_v44, %v1710_v8  ;;  %v1724_v15 = vadd.f32 %v748_v33, %v638_v57  ;;  %v816_v44 = vpop.permute.xlu1 %815 }
 0x31d   :  { %v1364_v46 = vpop.eup %1363  ;;  %v750_v1 = vmul.f32 0.6931472, %v1362_v45  ;;  %v845_v42 = vmul.f32 %v810_v52, %v1720_v61 }
 0x31e   :  { %v752_v19 = vmul.f32 0.6931472, %v1364_v46  ;;  %v846_v7 = vmul.f32 %v812_v62, %v1724_v15 }
 0x31f   :  { %881 = vrot.lane.b32.xlu0 %v841_v34, %s1482_s4  ;;  %v1731_v6 = vadd.f32 %v750_v1, %v639_v16 }
 0x320   :  { %883 = vrot.lane.b32.xlu1 %v842_v37, %s1482_s4  ;;  %v1734_v63 = vadd.f32 %v752_v19, %v640_v5 }
 0x321   :  { %v847_v23 = vmul.f32 %v814_v13, %v1731_v6 }
 0x322   :  { %v848_v27 = vmul.f32 %v816_v44, %v1734_v63 }
 0x323   :  { %877 = vrot.lane.b32.xlu0 %v839_v12, %s1482_s4 }
 0x324   :  { %879 = vrot.lane.b32.xlu1 %v840_v22, %s1482_s4 }
 0x327   :  { %873 = vrot.lane.b32.xlu0 %v837_v55, %s1482_s4 }
 0x328   :  { %875 = vrot.lane.b32.xlu1 %v838_v58, %s1482_s4 }
 0x32b   :  { %889 = vrot.lane.b32.xlu0 %v845_v42, %s1482_s4 }
 0x32c   :  { %891 = vrot.lane.b32.xlu1 %v846_v7, %s1482_s4 }
 0x32f   :  { %893 = vrot.lane.b32.xlu0 %v847_v23, %s1482_s4 }
 0x330   :  { %895 = vrot.lane.b32.xlu1 %v848_v27, %s1482_s4 }
 0x381   :  { %v870_v30 = vpop.permute.xlu0 %869 }
 0x382   :  { %v915_v31 = vadd.f32 %v870_v30, %v1572_v2  ;;  %v996_v30 = vsel %vm993_vm0, %v1572_v2, %v1653_v21  ;;  %v1004_v2 = vsel %vm993_vm0, %v1575_v14, %v1667_v48 }
 0x384   :  { %v872_v4 = vpop.permute.xlu1 %871  ;;  %949 = vrot.lane.b32.xlu0 %v915_v31, %s1483_s21 }
 0x385   :  { %v916_v34 = vadd.f32 %v872_v4, %v1588_v10 }
 0x387   :  { %951 = vrot.lane.b32.xlu1 %v916_v34, %s1483_s21  ;;  %v997_v34 = vsel %vm993_vm0, %v1588_v10, %v1657_v24  ;;  %v1005_v10 = vsel %vm993_vm0, %v1591_v11, %v1670_v54 }
 0x389   :  { %v886_v35 = vpop.permute.xlu0 %885 }
 0x38a   :  { %v923_v29 = vadd.f32 %v886_v35, %v1575_v14  ;;  %v888_v37 = vpop.permute.xlu1 %887  ;;  %v994_v14 = vsel %vm993_vm0, %v1580_v20, %v1672_v56 }
 0x38b   :  { %v924_v38 = vadd.f32 %v888_v37, %v1591_v11  ;;  %v995_v11 = vsel %vm993_vm0, %v1596_v28, %v1675_v0 }
 0x38c   :  { %965 = vrot.lane.b32.xlu0 %v923_v29, %s1483_s21 }
 0x38d   :  { %v866_v39 = vpop.permute.xlu0 %865  ;;  %967 = vrot.lane.b32.xlu1 %v924_v38, %s1483_s21 }
 0x38e   :  { %v913_v40 = vadd.f32 %v866_v39, %v1580_v20  ;;  %v868_v12 = vpop.permute.xlu1 %867  ;;  %v1002_v20 = vsel %vm993_vm0, %v1583_v3, %v1684_v9 }
 0x38f   :  { %v914_v43 = vadd.f32 %v868_v12, %v1596_v28  ;;  %v1003_v28 = vsel %vm993_vm0, %v1599_v26, %v1688_v25 }
 0x390   :  { %945 = vrot.lane.b32.xlu0 %v913_v40, %s1483_s21 }
 0x391   :  { %v882_v45 = vpop.permute.xlu0 %881  ;;  %947 = vrot.lane.b32.xlu1 %v914_v43, %s1483_s21 }
 0x392   :  { %v921_v22 = vadd.f32 %v882_v45, %v1583_v3  ;;  %v884_v33 = vpop.permute.xlu1 %883  ;;  %v1000_v3 = vsel %vm993_vm0, %v1602_v32, %v1694_v17 }
 0x393   :  { %v922_v46 = vadd.f32 %v884_v33, %v1599_v26  ;;  %v1001_v26 = vsel %vm993_vm0, %v1614_v50, %v1698_v36 }
 0x394   :  { %961 = vrot.lane.b32.xlu0 %v921_v22, %s1483_s21 }
 0x395   :  { %v878_v51 = vpop.permute.xlu0 %877  ;;  %963 = vrot.lane.b32.xlu1 %v922_v46, %s1483_s21 }
 0x396   :  { %v919_v52 = vadd.f32 %v878_v51, %v1602_v32  ;;  %v880_v57 = vpop.permute.xlu1 %879  ;;  %v998_v32 = vsel %vm993_vm0, %v1608_v47, %v1706_v41 }
 0x397   :  { %v920_v55 = vadd.f32 %v880_v57, %v1614_v50  ;;  %v999_v50 = vsel %vm993_vm0, %v1626_v60, %v1710_v8 }
 0x398   :  { %957 = vrot.lane.b32.xlu0 %v919_v52, %s1483_s21 }
 0x399   :  { %v874_v62 = vpop.permute.xlu0 %873  ;;  %959 = vrot.lane.b32.xlu1 %v920_v55, %s1483_s21 }
 0x39a   :  { %v917_v1 = vadd.f32 %v874_v62, %v1608_v47  ;;  %v876_v58 = vpop.permute.xlu1 %875  ;;  %v1006_v47 = vsel %vm993_vm0, %v1611_v49, %v1720_v61 }
 0x39b   :  { %v918_v19 = vadd.f32 %v876_v58, %v1626_v60  ;;  %v1007_v60 = vsel %vm993_vm0, %v1631_v18, %v1724_v15 }
 0x39c   :  { %953 = vrot.lane.b32.xlu0 %v917_v1, %s1483_s21 }
 0x39d   :  { %v890_v16 = vpop.permute.xlu0 %889  ;;  %955 = vrot.lane.b32.xlu1 %v918_v19, %s1483_s21 }
 0x39e   :  { %v925_v5 = vadd.f32 %v890_v16, %v1611_v49  ;;  %v892_v42 = vpop.permute.xlu1 %891  ;;  %v1008_v49 = vsel %vm993_vm0, %v1617_v53, %v1731_v6 }
 0x39f   :  { %v926_v7 = vadd.f32 %v892_v42, %v1631_v18  ;;  %v1009_v18 = vsel %vm993_vm0, %v1623_v59, %v1734_v63 }
 0x3a0   :  { %969 = vrot.lane.b32.xlu0 %v925_v5, %s1483_s21 }
 0x3a1   :  { %v894_v13 = vpop.permute.xlu0 %893  ;;  %971 = vrot.lane.b32.xlu1 %v926_v7, %s1483_s21 }
 0x3a2   :  { %v927_v44 = vadd.f32 %v894_v13, %v1617_v53  ;;  %v896_v23 = vpop.permute.xlu1 %895 }
 0x3a3   :  { %v928_v27 = vadd.f32 %v896_v23, %v1623_v59 }
 0x3a4   :  { %973 = vrot.lane.b32.xlu0 %v927_v44, %s1483_s21 }
 0x3a5   :  { %975 = vrot.lane.b32.xlu1 %v928_v27, %s1483_s21 }
 0x3f6   :  { %v950_v31 = vpop.permute.xlu0 %949 }
 0x3f7   :  { %v1013_v4 = vsel %vm1010_vm1, %v996_v30, %v950_v31 }
 0x3f8   :  { %v1030_v29 = vsel %vm1027_vm2, %v1013_v4, 0.0 }
 0x3f9   :  { %v952_v35 = vpop.permute.xlu1 %951  ;;  %1046 = vst [vmem:[#allocation10 + $0x10] sm:$0xff] %v1030_v29 }
 0x3fa   :  { %v1014_v37 = vsel %vm1010_vm1, %v997_v34, %v952_v35 }
 0x3fb   :  { %v1031_v38 = vsel %vm1027_vm2, %v1014_v37, 0.0 }
 0x3fc   :  { %1047 = vst [vmem:[#allocation10 + $0x18] sm:$0xff] %v1031_v38 }
 0x3fe   :  { %v966_v21 = vpop.permute.xlu0 %965 }
 0x3ff   :  { %v1021_v39 = vsel %vm1010_vm1, %v1004_v2, %v966_v21  ;;  %v968_v24 = vpop.permute.xlu1 %967 }
 0x400   :  { %v1038_v40 = vsel %vm1027_vm2, %v1021_v39, 0.0  ;;  %v1022_v12 = vsel %vm1010_vm1, %v1005_v10, %v968_v24 }
 0x401   :  { %1054 = vst [vmem:[#allocation10 + $0x50] sm:$0xff] %v1038_v40  ;;  %v1039_v43 = vsel %vm1027_vm2, %v1022_v12, 0.0 }
 0x402   :  { %1055 = vst [vmem:[#allocation10 + $0x58] sm:$0xff] %v1039_v43  ;;  %v946_v48 = vpop.permute.xlu0 %945 }
 0x403   :  { %v1011_v45 = vsel %vm1010_vm1, %v994_v14, %v946_v48  ;;  %v948_v54 = vpop.permute.xlu1 %947 }
 0x404   :  { %v1028_v22 = vsel %vm1027_vm2, %v1011_v45, 0.0  ;;  %v1012_v33 = vsel %vm1010_vm1, %v995_v11, %v948_v54 }
 0x405   :  { %1044 = vst [vmem:[#allocation10] sm:$0xff] %v1028_v22  ;;  %v1029_v46 = vsel %vm1027_vm2, %v1012_v33, 0.0 }
 0x406   :  { %1045 = vst [vmem:[#allocation10 + $0x8] sm:$0xff] %v1029_v46  ;;  %v962_v56 = vpop.permute.xlu0 %961 }
 0x407   :  { %v1019_v51 = vsel %vm1010_vm1, %v1002_v20, %v962_v56  ;;  %v964_v0 = vpop.permute.xlu1 %963 }
 0x408   :  { %v1036_v52 = vsel %vm1027_vm2, %v1019_v51, 0.0  ;;  %v1020_v57 = vsel %vm1010_vm1, %v1003_v28, %v964_v0 }
 0x409   :  { %1052 = vst [vmem:[#allocation10 + $0x40] sm:$0xff] %v1036_v52  ;;  %v1037_v55 = vsel %vm1027_vm2, %v1020_v57, 0.0 }
 0x40a   :  { %1053 = vst [vmem:[#allocation10 + $0x48] sm:$0xff] %v1037_v55  ;;  %v958_v9 = vpop.permute.xlu0 %957 }
 0x40b   :  { %v1017_v62 = vsel %vm1010_vm1, %v1000_v3, %v958_v9  ;;  %v960_v25 = vpop.permute.xlu1 %959 }
 0x40c   :  { %v1034_v1 = vsel %vm1027_vm2, %v1017_v62, 0.0  ;;  %v1018_v58 = vsel %vm1010_vm1, %v1001_v26, %v960_v25 }
 0x40d   :  { %1050 = vst [vmem:[#allocation10 + $0x30] sm:$0xff] %v1034_v1  ;;  %v1035_v19 = vsel %vm1027_vm2, %v1018_v58, 0.0 }
 0x40e   :  { %1051 = vst [vmem:[#allocation10 + $0x38] sm:$0xff] %v1035_v19  ;;  %v954_v17 = vpop.permute.xlu0 %953 }
 0x40f   :  { %v1015_v16 = vsel %vm1010_vm1, %v998_v32, %v954_v17  ;;  %v956_v36 = vpop.permute.xlu1 %955 }
 0x410   :  { %v1032_v5 = vsel %vm1027_vm2, %v1015_v16, 0.0  ;;  %v1016_v42 = vsel %vm1010_vm1, %v999_v50, %v956_v36 }
 0x411   :  { %1048 = vst [vmem:[#allocation10 + $0x20] sm:$0xff] %v1032_v5  ;;  %v1033_v7 = vsel %vm1027_vm2, %v1016_v42, 0.0 }
 0x412   :  { %1049 = vst [vmem:[#allocation10 + $0x28] sm:$0xff] %v1033_v7  ;;  %v970_v41 = vpop.permute.xlu0 %969 }
 0x413   :  { %v1023_v13 = vsel %vm1010_vm1, %v1006_v47, %v970_v41  ;;  %v972_v8 = vpop.permute.xlu1 %971 }
 0x414   :  { %v1040_v44 = vsel %vm1027_vm2, %v1023_v13, 0.0  ;;  %v1024_v23 = vsel %vm1010_vm1, %v1007_v60, %v972_v8 }
 0x415   :  { %1056 = vst [vmem:[#allocation10 + $0x60] sm:$0xff] %v1040_v44  ;;  %v1041_v27 = vsel %vm1027_vm2, %v1024_v23, 0.0 }
 0x416   :  { %1057 = vst [vmem:[#allocation10 + $0x68] sm:$0xff] %v1041_v27  ;;  %v974_v61 = vpop.permute.xlu0 %973 }
 0x417   :  { %v1025_v30 = vsel %vm1010_vm1, %v1008_v49, %v974_v61  ;;  %v976_v15 = vpop.permute.xlu1 %975 }
 0x418   :  { %v1042_v31 = vsel %vm1027_vm2, %v1025_v30, 0.0  ;;  %v1026_v4 = vsel %vm1010_vm1, %v1009_v18, %v976_v15 }
 0x419   :  { %1058 = vst [vmem:[#allocation10 + $0x70] sm:$0xff] %v1042_v31  ;;  %v1043_v34 = vsel %vm1027_vm2, %v1026_v4, 0.0 }
 0x41a   :  { %1059 = vst [vmem:[#allocation10 + $0x78] sm:$0xff] %v1043_v34 }
 0x41b   :  { %1456 = shalt.err (!%p1453_p10)
}
 0x41c   :  { %1071 = dma.vmem_to_hbm [thread:$0]  %s1066_s23, 2048, %s1866_s6, [#allocation4], %s1479_s0, %s1479_s0, %s1480_s16  }
 0x41d   :  { %1471 = dma.done.wait [#allocation4], 2048  }
 0x41e   :  { %1472 = vsyncadd [#allocation4], 4294965248 }
 0x41f   :  { %1075 = vsyncpa [#allocation3], 1 }
 0x420   :  { %1076 = vsyncpa [#allocation6], 1 }
 0x421   :  { %1077 = vsyncpa [#allocation9], 1 }
 0x422   :  { %1078 = vsyncpa [#allocation4], 1 }

</bundles_post_ra>
